<compile_context>
chip_gen: v7x
topology: tpu7x:2x2x1
jax: 0.10.0
libtpu: 0.0.40
codegen_flags: <defaults>
</compile_context>

<pallas_src>
import functools

import jax
import jax.numpy as jnp
from jax.experimental import pallas as pl
from jax.experimental.pallas import tpu as pltpu


def _pdg_kernel(M_total, lam_ref, x_ref, y_ref, obs_ref, out_ref,
                acc_tv, acc_sq, acc_rsq, carry_ref):
    f32 = jnp.float32
    i = pl.program_id(0)
    n_tiles = pl.num_programs(0)

    @pl.when(i == 0)
    def _init():
        acc_tv[...] = jnp.zeros_like(acc_tv)
        acc_sq[...] = jnp.zeros_like(acc_sq)
        acc_rsq[...] = jnp.zeros_like(acc_rsq)
        carry_ref[...] = jnp.zeros_like(carry_ref)

    x = x_ref[0].astype(f32)      # (tm, N) primal variable (row tile)
    obs = obs_ref[0].astype(f32)  # (tm, N) observed image
    y0 = y_ref[0].astype(f32)     # (tm, N) horizontal dual field
    y1 = y_ref[1].astype(f32)     # (tm, N) vertical dual field
    tm, N = x.shape

    # Rows carried from the previous tile (zeros for the first tile).
    carry_x = jnp.broadcast_to(carry_ref[0:1, :], (tm, N))
    carry_y = jnp.broadcast_to(carry_ref[1:2, :], (tm, N))

    # Boundary predicates, built once per tile.
    lrow = jax.lax.broadcasted_iota(jnp.int32, (tm, N), 0)          # local row in tile
    col = jax.lax.broadcasted_iota(jnp.int32, (tm, N), 1)
    grow = lrow + i * tm                                            # global row in image
    col_ge1 = col >= 1
    col_lt_last = col < (N - 1)
    lrow_ge1 = lrow >= 1
    grow_ge1 = grow >= 1
    grow_lt_last = grow < (M_total - 1)

    # All +/-1 shifts as single XLU rolls (previous element along lanes / sublanes).
    x_pc = pltpu.roll(x, shift=1, axis=1)    # x[:, j-1] (wraparound masked below)
    x_pr = pltpu.roll(x, shift=1, axis=0)    # x[i-1, :] within the tile
    y0_pc = pltpu.roll(y0, shift=1, axis=1)  # y0[:, j-1]
    y1_pr = pltpu.roll(y1, shift=1, axis=0)  # y1[i-1, :] within the tile

    # --- primal: TV regularizer -------------------------------------------
    # Forward differences re-indexed as backward differences (identical L1 sum),
    # so every shift is a +1 roll and the tile seam uses the carried row.
    # TODO(synk): the PyTorch ForwardWeightedGradient multiplies by `w`, but the spec
    # passes a dtype class for w; the weight is treated as 1.0 here.
    gh = jnp.where(col_ge1, x - x_pc, 0.0)
    x_prev = jnp.where(lrow_ge1, x_pr, carry_x)
    gv = jnp.where(grow_ge1, x - x_prev, 0.0)

    # --- primal: data term partial (sqrt and lambda deferred to finalize) ---
    diff = x - obs

    # --- dual: backward divergence ------------------------------------------
    d_h = jnp.where(col_lt_last, y0, 0.0) - jnp.where(col_ge1, y0_pc, 0.0)
    y1_prev = jnp.where(lrow_ge1, y1_pr, carry_y)
    d_v = jnp.where(grow_lt_last, y1, 0.0) - jnp.where(grow_ge1, y1_prev, 0.0)
    r = obs - (d_h + d_v)

    # Fused per-tile reductions over rows into lane-wise accumulators.
    acc_tv[...] += jnp.sum(jnp.abs(gh) + jnp.abs(gv), axis=0, keepdims=True)
    acc_sq[...] += jnp.sum(diff * diff, axis=0, keepdims=True)
    acc_rsq[...] += jnp.sum(r * r, axis=0, keepdims=True)

    # Carry this tile's last rows for the next tile's seam terms.
    carry_ref[0:1, :] = x[tm - 1:tm, :]
    carry_ref[1:2, :] = y1[tm - 1:tm, :]

    @pl.when(i == n_tiles - 1)
    def _finalize():
        lam = lam_ref[0].astype(f32)
        tv = jnp.sum(acc_tv[...])
        sq = jnp.sum(acc_sq[...])
        rsq = jnp.sum(acc_rsq[...])
        # gap = energy_reg + 0.5*lam*||x-obs||_2 - (-0.5*sum(r^2))
        gap = tv + 0.5 * lam * jnp.sqrt(sq) + 0.5 * rsq
        out_ref[...] = jnp.full((1, 1), gap, dtype=out_ref.dtype)


def _pick_block_rows(M, target=256):
    """Largest row tile <= target that divides M and is a multiple of 8 (or the full M)."""
    if M <= target:
        return M
    for d in range(target, 7, -1):
        if M % d == 0 and d % 8 == 0:
            return d
    return M


def primal_dual_gap(x, y, im_obs, clambda, block_rows=None):
    """Pallas TPU implementation of PrimalDualGap.forward(x, y, im_obs, clambda).

    x: [1, M, N], y: [2, M, N], im_obs: [1, M, N], clambda: scalar. Returns scalar gap.
    """
    assert x.ndim == 3 and x.shape[0] == 1, "x must be [1, M, N]"
    assert y.ndim == 3 and y.shape[0] == 2, "y must be [2, M, N]"
    assert im_obs.shape == x.shape, "im_obs must match x"
    _, M, N = x.shape
    assert M >= 2 and N >= 2

    if block_rows is None:
        block_rows = _pick_block_rows(M)
    assert M % block_rows == 0, "block_rows must divide M"
    assert block_rows == M or block_rows % 8 == 0, "row tile must be a multiple of 8"
    n_tiles = M // block_rows

    lam = jnp.asarray([clambda], dtype=jnp.float32)

    # VMEM budget: 4 f32 input planes per tile, double buffered, plus headroom for temporaries.
    tile_bytes = 4 * block_rows * N * 4
    vmem_limit = int(min(60 * 1024 * 1024, max(16 * 1024 * 1024, 8 * tile_bytes)))

    kernel = functools.partial(_pdg_kernel, M)

    grid_spec = pltpu.PrefetchScalarGridSpec(
        num_scalar_prefetch=0,
        grid=(n_tiles,),
        in_specs=[
            pl.BlockSpec(memory_space=pltpu.SMEM),                   # lambda (1,) scalar
            pl.BlockSpec((1, block_rows, N), lambda i: (0, i, 0)),   # x row tile
            pl.BlockSpec((2, block_rows, N), lambda i: (0, i, 0)),   # y (both dual planes)
            pl.BlockSpec((1, block_rows, N), lambda i: (0, i, 0)),   # im_obs row tile
        ],
        out_specs=pl.BlockSpec((1, 1), lambda i: (0, 0)),
        scratch_shapes=[
            pltpu.VMEM((1, N), jnp.float32),   # TV partial sums (per lane)
            pltpu.VMEM((1, N), jnp.float32),   # ||x - obs||^2 partial sums
            pltpu.VMEM((1, N), jnp.float32),   # ||obs - div||^2 partial sums
            pltpu.VMEM((2, N), jnp.float32),   # carried last rows of x and y1
        ],
    )

    out = pl.pallas_call(
        kernel,
        out_shape=jax.ShapeDtypeStruct((1, 1), jnp.float32),
        grid_spec=grid_spec,
        compiler_params=pltpu.CompilerParams(
            dimension_semantics=("arbitrary",),   # carried seam rows => sequential reduction
            vmem_limit_bytes=vmem_limit,
        ),
    )(lam, x, y, im_obs)
    return out[0, 0]


def _reference(x, y, im_obs, clambda):
    """Pure-JAX reference of the PyTorch module semantics."""
    x2, obs = x[0], im_obs[0]
    y0, y1 = y[0], y[1]
    gh = jnp.zeros_like(x2).at[:, :-1].set(x2[:, 1:] - x2[:, :-1])
    gv = jnp.zeros_like(x2).at[:-1, :].set(x2[1:, :] - x2[:-1, :])
    energy_reg = jnp.sum(jnp.abs(gh)) + jnp.sum(jnp.abs(gv))
    energy_data = 0.5 * clambda * jnp.sqrt(jnp.sum((x2 - obs) ** 2))
    d_h = jnp.zeros_like(y0)
    d_h = d_h.at[:, 0].set(y0[:, 0])
    d_h = d_h.at[:, 1:-1].set(y0[:, 1:-1] - y0[:, :-2])
    d_h = d_h.at[:, -1].set(-y0[:, -2])
    d_v = jnp.zeros_like(y1)
    d_v = d_v.at[0, :].set(y1[0, :])
    d_v = d_v.at[1:-1, :].set(y1[1:-1, :] - y1[:-2, :])
    d_v = d_v.at[-1, :].set(-y1[-2, :])
    dual = -0.5 * jnp.sum((obs - (d_h + d_v)) ** 2)
    return energy_reg + energy_data - dual


if __name__ == "__main__":
    key = jax.random.PRNGKey(0)
    kx, ky, ko = jax.random.split(key, 3)
    # Small but non-trivial: full 128-lane width, 4 row tiles of 64 to exercise the
    # partial-sum accumulation and the carried-row seam path.
    M, N = 256, 128
    x = jax.random.normal(kx, (1, M, N), dtype=jnp.float32)
    y = jax.random.normal(ky, (2, M, N), dtype=jnp.float32)
    im_obs = jax.random.normal(ko, (1, M, N), dtype=jnp.float32)
    clambda = 0.7

    gap = primal_dual_gap(x, y, im_obs, clambda, block_rows=64)
    gap = jax.block_until_ready(gap)

    ref = _reference(x, y, im_obs, clambda)
    assert gap.shape == ()
    assert jnp.allclose(gap, ref, rtol=5e-4, atol=1e-3), (float(gap), float(ref))
    print("KERNEL_OK")
</pallas_src>

<mosaic_0001>
module attributes {stable_mosaic.version = 11 : i64} {
  func.func @_pdg_kernel(%arg0: i32, %arg1: memref<1xf32, #tpu.memory_space<smem>>, %arg2: memref<1x64x128xf32, #tpu.memory_space<vmem>>, %arg3: memref<2x64x128xf32, #tpu.memory_space<vmem>>, %arg4: memref<1x64x128xf32, #tpu.memory_space<vmem>>, %arg5: memref<1x1xf32, #tpu.memory_space<vmem>>, %arg6: memref<1x128xf32, #tpu.memory_space<vmem>>, %arg7: memref<1x128xf32, #tpu.memory_space<vmem>>, %arg8: memref<1x128xf32, #tpu.memory_space<vmem>>, %arg9: memref<2x128xf32, #tpu.memory_space<vmem>>) attributes {dimension_semantics = [#tpu.dimension_semantics<arbitrary>], iteration_bounds = array<i64: 4>, scalar_prefetch = 0 : i64, scratch_operands = 4 : i64, tpu.core_type = #tpu.core_type<tc>, window_params = [{transform_indices = @transform_0, window_bounds = array<i64: 1>}, {transform_indices = @transform_1, window_bounds = array<i64: 1, 64, 128>}, {transform_indices = @transform_2, window_bounds = array<i64: 2, 64, 128>}, {transform_indices = @transform_3, window_bounds = array<i64: 1, 64, 128>}, {pipeline_mode = #tpu.pipeline_mode<synchronous>, transform_indices = @transform_4, window_bounds = array<i64: 1, 1>}]} {
    %c0_i32 = arith.constant 0 : i32
    %0 = arith.cmpi eq, %arg0, %c0_i32 : i32
    %1 = arith.extui %0 : i1 to i32
    %c0_i32_0 = arith.constant 0 : i32
    %2 = arith.cmpi ne, %1, %c0_i32_0 : i32
    scf.if %2 {
      %cst_46 = arith.constant 0.000000e+00 : f32
      %84 = vector.broadcast %cst_46 : f32 to vector<1x128xf32>
      %c0_47 = arith.constant 0 : index
      %c0_48 = arith.constant 0 : index
      %85 = vector.load %arg6[%c0_47, %c0_48] : memref<1x128xf32, #tpu.memory_space<vmem>>, vector<1x128xf32>
      tpu.vector_store %arg6[%c0_47, %c0_48], %84 {strides = array<i32>} : memref<1x128xf32, #tpu.memory_space<vmem>>, vector<1x128xf32>,
      %cst_49 = arith.constant 0.000000e+00 : f32
      %86 = vector.broadcast %cst_49 : f32 to vector<1x128xf32>
      %c0_50 = arith.constant 0 : index
      %c0_51 = arith.constant 0 : index
      %87 = vector.load %arg7[%c0_50, %c0_51] : memref<1x128xf32, #tpu.memory_space<vmem>>, vector<1x128xf32>
      tpu.vector_store %arg7[%c0_50, %c0_51], %86 {strides = array<i32>} : memref<1x128xf32, #tpu.memory_space<vmem>>, vector<1x128xf32>,
      %cst_52 = arith.constant 0.000000e+00 : f32
      %88 = vector.broadcast %cst_52 : f32 to vector<1x128xf32>
      %c0_53 = arith.constant 0 : index
      %c0_54 = arith.constant 0 : index
      %89 = vector.load %arg8[%c0_53, %c0_54] : memref<1x128xf32, #tpu.memory_space<vmem>>, vector<1x128xf32>
      tpu.vector_store %arg8[%c0_53, %c0_54], %88 {strides = array<i32>} : memref<1x128xf32, #tpu.memory_space<vmem>>, vector<1x128xf32>,
      %cst_55 = arith.constant 0.000000e+00 : f32
      %90 = vector.broadcast %cst_55 : f32 to vector<2x128xf32>
      %c0_56 = arith.constant 0 : index
      %c0_57 = arith.constant 0 : index
      %91 = vector.load %arg9[%c0_56, %c0_57] : memref<2x128xf32, #tpu.memory_space<vmem>>, vector<2x128xf32>
      tpu.vector_store %arg9[%c0_56, %c0_57], %90 {strides = array<i32>} : memref<2x128xf32, #tpu.memory_space<vmem>>, vector<2x128xf32>,
    } else {
    }
    %c0 = arith.constant 0 : index
    %c0_1 = arith.constant 0 : index
    %c0_2 = arith.constant 0 : index
    %3 = vector.load %arg2[%c0, %c0_1, %c0_2] : memref<1x64x128xf32, #tpu.memory_space<vmem>>, vector<1x64x128xf32>
    %4 = vector.shape_cast %3 : vector<1x64x128xf32> to vector<64x128xf32>
    %c0_3 = arith.constant 0 : index
    %c0_4 = arith.constant 0 : index
    %c0_5 = arith.constant 0 : index
    %5 = vector.load %arg4[%c0_3, %c0_4, %c0_5] : memref<1x64x128xf32, #tpu.memory_space<vmem>>, vector<1x64x128xf32>
    %6 = vector.shape_cast %5 : vector<1x64x128xf32> to vector<64x128xf32>
    %c0_6 = arith.constant 0 : index
    %c0_7 = arith.constant 0 : index
    %c0_8 = arith.constant 0 : index
    %7 = vector.load %arg3[%c0_6, %c0_7, %c0_8] : memref<2x64x128xf32, #tpu.memory_space<vmem>>, vector<1x64x128xf32>
    %8 = vector.shape_cast %7 : vector<1x64x128xf32> to vector<64x128xf32>
    %c1 = arith.constant 1 : index
    %c0_9 = arith.constant 0 : index
    %c0_10 = arith.constant 0 : index
    %9 = vector.load %arg3[%c1, %c0_9, %c0_10] : memref<2x64x128xf32, #tpu.memory_space<vmem>>, vector<1x64x128xf32>
    %10 = vector.shape_cast %9 : vector<1x64x128xf32> to vector<64x128xf32>
    %c0_11 = arith.constant 0 : index
    %c0_12 = arith.constant 0 : index
    %11 = vector.load %arg9[%c0_11, %c0_12] : memref<2x128xf32, #tpu.memory_space<vmem>>, vector<1x128xf32>
    %12 = vector.shape_cast %11 : vector<1x128xf32> to vector<1x128xf32>
    %13 = vector.broadcast %12 : vector<1x128xf32> to vector<64x128xf32>
    %c1_13 = arith.constant 1 : index
    %c0_14 = arith.constant 0 : index
    %14 = vector.load %arg9[%c1_13, %c0_14] : memref<2x128xf32, #tpu.memory_space<vmem>>, vector<1x128xf32>
    %15 = vector.shape_cast %14 : vector<1x128xf32> to vector<1x128xf32>
    %16 = vector.broadcast %15 : vector<1x128xf32> to vector<64x128xf32>
    %17 = tpu.iota {dimensions = array<i32: 0>} : vector<64x128xi32>
    %18 = tpu.iota {dimensions = array<i32: 1>} : vector<64x128xi32>
    %c64_i32 = arith.constant 64 : i32
    %19 = arith.muli %arg0, %c64_i32 : i32
    %20 = vector.broadcast %19 : i32 to vector<64x128xi32>
    %21 = arith.addi %17, %20 : vector<64x128xi32>
    %c1_i32 = arith.constant 1 : i32
    %22 = vector.broadcast %c1_i32 : i32 to vector<64x128xi32>
    %23 = arith.cmpi sge, %18, %22 : vector<64x128xi32>
    %c127_i32 = arith.constant 127 : i32
    %24 = vector.broadcast %c127_i32 : i32 to vector<64x128xi32>
    %25 = arith.cmpi slt, %18, %24 : vector<64x128xi32>
    %c1_i32_15 = arith.constant 1 : i32
    %26 = vector.broadcast %c1_i32_15 : i32 to vector<64x128xi32>
    %27 = arith.cmpi sge, %17, %26 : vector<64x128xi32>
    %c1_i32_16 = arith.constant 1 : i32
    %28 = vector.broadcast %c1_i32_16 : i32 to vector<64x128xi32>
    %29 = arith.cmpi sge, %21, %28 : vector<64x128xi32>
    %c255_i32 = arith.constant 255 : i32
    %30 = vector.broadcast %c255_i32 : i32 to vector<64x128xi32>
    %31 = arith.cmpi slt, %21, %30 : vector<64x128xi32>
    %c1_i32_17 = arith.constant 1 : i32
    %32 = tpu.dynamic_rotate %4 by %c1_i32_17 dim 1 : vector<64x128xf32>, i32 -> vector<64x128xf32>
    %c1_i32_18 = arith.constant 1 : i32
    %33 = tpu.dynamic_rotate %4 by %c1_i32_18 dim 0 : vector<64x128xf32>, i32 -> vector<64x128xf32>
    %c1_i32_19 = arith.constant 1 : i32
    %34 = tpu.dynamic_rotate %8 by %c1_i32_19 dim 1 : vector<64x128xf32>, i32 -> vector<64x128xf32>
    %c1_i32_20 = arith.constant 1 : i32
    %35 = tpu.dynamic_rotate %10 by %c1_i32_20 dim 0 : vector<64x128xf32>, i32 -> vector<64x128xf32>
    %36 = arith.subf %4, %32 : vector<64x128xf32>
    %cst = arith.constant 0.000000e+00 : f32
    %37 = vector.broadcast %cst : f32 to vector<64x128xf32>
    %38 = arith.select %23, %36, %37 : vector<64x128xi1>, vector<64x128xf32>
    %39 = arith.select %27, %33, %13 : vector<64x128xi1>, vector<64x128xf32>
    %40 = arith.subf %4, %39 : vector<64x128xf32>
    %cst_21 = arith.constant 0.000000e+00 : f32
    %41 = vector.broadcast %cst_21 : f32 to vector<64x128xf32>
    %42 = arith.select %29, %40, %41 : vector<64x128xi1>, vector<64x128xf32>
    %43 = arith.subf %4, %6 : vector<64x128xf32>
    %cst_22 = arith.constant 0.000000e+00 : f32
    %44 = vector.broadcast %cst_22 : f32 to vector<64x128xf32>
    %45 = arith.select %25, %8, %44 : vector<64x128xi1>, vector<64x128xf32>
    %cst_23 = arith.constant 0.000000e+00 : f32
    %46 = vector.broadcast %cst_23 : f32 to vector<64x128xf32>
    %47 = arith.select %23, %34, %46 : vector<64x128xi1>, vector<64x128xf32>
    %48 = arith.subf %45, %47 : vector<64x128xf32>
    %49 = arith.select %27, %35, %16 : vector<64x128xi1>, vector<64x128xf32>
    %cst_24 = arith.constant 0.000000e+00 : f32
    %50 = vector.broadcast %cst_24 : f32 to vector<64x128xf32>
    %51 = arith.select %31, %10, %50 : vector<64x128xi1>, vector<64x128xf32>
    %cst_25 = arith.constant 0.000000e+00 : f32
    %52 = vector.broadcast %cst_25 : f32 to vector<64x128xf32>
    %53 = arith.select %29, %49, %52 : vector<64x128xi1>, vector<64x128xf32>
    %54 = arith.subf %51, %53 : vector<64x128xf32>
    %55 = arith.addf %48, %54 : vector<64x128xf32>
    %56 = arith.subf %6, %55 : vector<64x128xf32>
    %c0_26 = arith.constant 0 : index
    %c0_27 = arith.constant 0 : index
    %57 = vector.load %arg6[%c0_26, %c0_27] : memref<1x128xf32, #tpu.memory_space<vmem>>, vector<1x128xf32>
    %58 = math.absf %38 : vector<64x128xf32>
    %59 = math.absf %42 : vector<64x128xf32>
    %60 = arith.addf %58, %59 : vector<64x128xf32>
    %cst_28 = arith.constant dense<0.000000e+00> : vector<128xf32>
    %61 = vector.multi_reduction <add>, %60, %cst_28 [0] : vector<64x128xf32> to vector<128xf32>
    %62 = vector.shape_cast %61 : vector<128xf32> to vector<1x128xf32>
    %63 = arith.addf %57, %62 : vector<1x128xf32>
    %c0_29 = arith.constant 0 : index
    %c0_30 = arith.constant 0 : index
    %64 = vector.load %arg6[%c0_29, %c0_30] : memref<1x128xf32, #tpu.memory_space<vmem>>, vector<1x128xf32>
    tpu.vector_store %arg6[%c0_29, %c0_30], %63 {strides = array<i32>} : memref<1x128xf32, #tpu.memory_space<vmem>>, vector<1x128xf32>,
    %c0_31 = arith.constant 0 : index
    %c0_32 = arith.constant 0 : index
    %65 = vector.load %arg7[%c0_31, %c0_32] : memref<1x128xf32, #tpu.memory_space<vmem>>, vector<1x128xf32>
    %66 = arith.mulf %43, %43 : vector<64x128xf32>
    %cst_33 = arith.constant dense<0.000000e+00> : vector<128xf32>
    %67 = vector.multi_reduction <add>, %66, %cst_33 [0] : vector<64x128xf32> to vector<128xf32>
    %68 = vector.shape_cast %67 : vector<128xf32> to vector<1x128xf32>
    %69 = arith.addf %65, %68 : vector<1x128xf32>
    %c0_34 = arith.constant 0 : index
    %c0_35 = arith.constant 0 : index
    %70 = vector.load %arg7[%c0_34, %c0_35] : memref<1x128xf32, #tpu.memory_space<vmem>>, vector<1x128xf32>
    tpu.vector_store %arg7[%c0_34, %c0_35], %69 {strides = array<i32>} : memref<1x128xf32, #tpu.memory_space<vmem>>, vector<1x128xf32>,
    %c0_36 = arith.constant 0 : index
    %c0_37 = arith.constant 0 : index
    %71 = vector.load %arg8[%c0_36, %c0_37] : memref<1x128xf32, #tpu.memory_space<vmem>>, vector<1x128xf32>
    %72 = arith.mulf %56, %56 : vector<64x128xf32>
    %cst_38 = arith.constant dense<0.000000e+00> : vector<128xf32>
    %73 = vector.multi_reduction <add>, %72, %cst_38 [0] : vector<64x128xf32> to vector<128xf32>
    %74 = vector.shape_cast %73 : vector<128xf32> to vector<1x128xf32>
    %75 = arith.addf %71, %74 : vector<1x128xf32>
    %c0_39 = arith.constant 0 : index
    %c0_40 = arith.constant 0 : index
    %76 = vector.load %arg8[%c0_39, %c0_40] : memref<1x128xf32, #tpu.memory_space<vmem>>, vector<1x128xf32>
    tpu.vector_store %arg8[%c0_39, %c0_40], %75 {strides = array<i32>} : memref<1x128xf32, #tpu.memory_space<vmem>>, vector<1x128xf32>,
    %77 = vector.extract_strided_slice %4 {offsets = [63, 0], sizes = [1, 128], strides = [1, 1]} : vector<64x128xf32> to vector<1x128xf32>
    %c0_41 = arith.constant 0 : index
    %c0_42 = arith.constant 0 : index
    %78 = vector.load %arg9[%c0_41, %c0_42] : memref<2x128xf32, #tpu.memory_space<vmem>>, vector<1x128xf32>
    tpu.vector_store %arg9[%c0_41, %c0_42], %77 {strides = array<i32>} : memref<2x128xf32, #tpu.memory_space<vmem>>, vector<1x128xf32>,
    %79 = vector.extract_strided_slice %10 {offsets = [63, 0], sizes = [1, 128], strides = [1, 1]} : vector<64x128xf32> to vector<1x128xf32>
    %c1_43 = arith.constant 1 : index
    %c0_44 = arith.constant 0 : index
    %80 = vector.load %arg9[%c1_43, %c0_44] : memref<2x128xf32, #tpu.memory_space<vmem>>, vector<1x128xf32>
    tpu.vector_store %arg9[%c1_43, %c0_44], %79 {strides = array<i32>} : memref<2x128xf32, #tpu.memory_space<vmem>>, vector<1x128xf32>,
    %c3_i32 = arith.constant 3 : i32
    %81 = arith.cmpi eq, %arg0, %c3_i32 : i32
    %82 = arith.extui %81 : i1 to i32
    %c0_i32_45 = arith.constant 0 : i32
    %83 = arith.cmpi ne, %82, %c0_i32_45 : i32
    scf.if %83 {
      %c0_46 = arith.constant 0 : index
      %84 = memref.load %arg1[%c0_46] : memref<1xf32, #tpu.memory_space<smem>>
      %c0_47 = arith.constant 0 : index
      %c0_48 = arith.constant 0 : index
      %85 = vector.load %arg6[%c0_47, %c0_48] : memref<1x128xf32, #tpu.memory_space<vmem>>, vector<1x128xf32>
      %86 = vector.shape_cast %85 : vector<1x128xf32> to vector<1x1x128xf32>
      %cst_49 = arith.constant dense<0.000000e+00> : vector<1xf32>
      %87 = vector.multi_reduction <add>, %86, %cst_49 [1, 2] : vector<1x1x128xf32> to vector<1xf32>
      %88 = vector.shape_cast %87 : vector<1xf32> to vector<1x1x1xf32>
      %89 = vector.extract %88[0, 0, 0] : f32 from vector<1x1x1xf32>
      %c0_50 = arith.constant 0 : index
      %c0_51 = arith.constant 0 : index
      %90 = vector.load %arg7[%c0_50, %c0_51] : memref<1x128xf32, #tpu.memory_space<vmem>>, vector<1x128xf32>
      %91 = vector.shape_cast %90 : vector<1x128xf32> to vector<1x1x128xf32>
      %cst_52 = arith.constant dense<0.000000e+00> : vector<1xf32>
      %92 = vector.multi_reduction <add>, %91, %cst_52 [1, 2] : vector<1x1x128xf32> to vector<1xf32>
      %93 = vector.shape_cast %92 : vector<1xf32> to vector<1x1x1xf32>
      %94 = vector.extract %93[0, 0, 0] : f32 from vector<1x1x1xf32>
      %c0_53 = arith.constant 0 : index
      %c0_54 = arith.constant 0 : index
      %95 = vector.load %arg8[%c0_53, %c0_54] : memref<1x128xf32, #tpu.memory_space<vmem>>, vector<1x128xf32>
      %96 = vector.shape_cast %95 : vector<1x128xf32> to vector<1x1x128xf32>
      %cst_55 = arith.constant dense<0.000000e+00> : vector<1xf32>
      %97 = vector.multi_reduction <add>, %96, %cst_55 [1, 2] : vector<1x1x128xf32> to vector<1xf32>
      %98 = vector.shape_cast %97 : vector<1xf32> to vector<1x1x1xf32>
      %99 = vector.extract %98[0, 0, 0] : f32 from vector<1x1x1xf32>
      %cst_56 = arith.constant 5.000000e-01 : f32
      %100 = arith.mulf %cst_56, %84 : f32
      %101 = math.sqrt %94 : f32
      %102 = arith.mulf %100, %101 : f32
      %103 = arith.addf %89, %102 : f32
      %cst_57 = arith.constant 5.000000e-01 : f32
      %104 = arith.mulf %cst_57, %99 : f32
      %105 = arith.addf %103, %104 : f32
      %106 = vector.broadcast %105 : f32 to vector<1x1xf32>
      %c0_58 = arith.constant 0 : index
      %c0_59 = arith.constant 0 : index
      %107 = vector.load %arg5[%c0_58, %c0_59] : memref<1x1xf32, #tpu.memory_space<vmem>>, vector<1x1xf32>
      tpu.vector_store %arg5[%c0_58, %c0_59], %106 {strides = array<i32>} : memref<1x1xf32, #tpu.memory_space<vmem>>, vector<1x1xf32>,
    } else {
    }
    return
  }
  func.func @transform_0(%arg0: i32) -> i32 {
    %c0_i32 = arith.constant 0 : i32
    %c0_i32_0 = arith.constant 0 : i32
    return %c0_i32 : i32
  }
  func.func @transform_1(%arg0: i32) -> (i32, i32, i32) {
    %c0_i32 = arith.constant 0 : i32
    %c0_i32_0 = arith.constant 0 : i32
    %c0_i32_1 = arith.constant 0 : i32
    return %c0_i32, %arg0, %c0_i32_0 : i32, i32, i32
  }
  func.func @transform_2(%arg0: i32) -> (i32, i32, i32) {
    %c0_i32 = arith.constant 0 : i32
    %c0_i32_0 = arith.constant 0 : i32
    %c0_i32_1 = arith.constant 0 : i32
    return %c0_i32, %arg0, %c0_i32_0 : i32, i32, i32
  }
  func.func @transform_3(%arg0: i32) -> (i32, i32, i32) {
    %c0_i32 = arith.constant 0 : i32
    %c0_i32_0 = arith.constant 0 : i32
    %c0_i32_1 = arith.constant 0 : i32
    return %c0_i32, %arg0, %c0_i32_0 : i32, i32, i32
  }
  func.func @transform_4(%arg0: i32) -> (i32, i32) {
    %c0_i32 = arith.constant 0 : i32
    %c0_i32_0 = arith.constant 0 : i32
    %c0_i32_1 = arith.constant 0 : i32
    return %c0_i32, %c0_i32_0 : i32, i32
  }
}

</mosaic_0001>

<bundles_post_ra>
// kernel: tpu_custom_call.1
= control target key start
LH: loop header
LB: loop body
LE: loop exit
PB: predicated region body
PF: predicated region fallthrough
CT: control target
= control target key end

     0   :  { %s1759_s0 = inlined_call_operand.<no memory space> [shape: f32[1], index: 0, kind: input, shape index: {}]   ;;  %s1760_s1 = inlined_call_operand.hbm [shape: f32[1,256,128], index: 1, kind: input, shape index: {}]   ;;  %s1761_s2 = inlined_call_operand.hbm [shape: f32[2,256,128], index: 2, kind: input, shape index: {}]   ;;  %s1762_s3 = inlined_call_operand.hbm [shape: f32[1,256,128], index: 3, kind: input, shape index: {}]   ;;  %s1763_s4 = inlined_call_operand.hbm [shape: f32[1,1], index: 4, kind: output, shape index: {}]  }
   0x1   :  { %9 = sst [smem:[#allocation6]] %s1759_s0 }
   0x2   :  { %10 = vsyncpa [#allocation8], 0 }
   0x3   :  { %12 = vsyncpa [#allocation8 + $0x1], 0 }
   0x4   :  { %13 = vsyncpa [#allocation11], 0 }
   0x5   :  { %15 = vsyncpa [#allocation11 + $0x1], 0 }
   0x6   :  { %16 = vsyncpa [#allocation9], 0  ;;  %s1114_s17 = smov 0   ;;  %s1116_s18 = smov 0  }
   0x7   :  { %s1118_s19 = smov 0   ;;  %s1120_s20 = smov 0  }
   0x8 LB: > { %s1133_s0 = sadd.s32 4294967295, %s1072_s20   ;;  %s1136_s21 = sadd.s32 1, %s1072_s20   ;;  %s1072_s20 = sphi %s1120_s20, %s1776_s20   ;;  %s1068_s19 = sphi %s1118_s19, %s1775_s19   ;;  %s1064_s18 = sphi %s1116_s18, %s1774_s18   ;;  %s1060_s17 = sphi %s1114_s17, %s1773_s17  }
   0x9   : > { %s47_s22 = ssub.s32 %s1072_s20, %s1136_s21  ;;  %s50_s23 = sadd.s32 1, %s1068_s19 }
   0xa   : > { %p48_p0 = scmp.eq.s32.totalorder %s47_s22, 0  ;;  %p57_p1 = scmp.ne.s32.totalorder %s1068_s19, %s1064_s18 }
   0xb   : > { %p58_p2 = scmp.eq.s32.totalorder %s1072_s20, 0  ;;  %p63_p3 = scmp.ne.s32.totalorder %s1064_s18, %s1060_s17 }
   0xc   : > { %s1146_s24 = scalar_select %p48_p0, %s1068_s19, %s50_s23  }
   0xd   : > { %p1148_p4 = por %p58_p2, %p57_p1  ;;  %p64_p5 = scmp.eq.s32.totalorder %s1133_s0, 0 }
   0xe   : > { %p841_p7 = scmp.ge.s32.totalorder %s1072_s20, 4 }
   0xf   : > { %p1153_p6 = por %p64_p5, %p63_p3  ;;  %s1159_s27 = sand.u32 (!%p841_p7), 1, %s1068_s19  }
  0x10   : > { %159 = sbr.rel (%p841_p7) target bundleno = 77 (0x4d), region = 20  ;;  %s1162_s28 = sshll.u32 (!%p841_p7), %s1072_s20, 10 }
  0x11   : > { %s842_s29 = sshll.u32 (!%p841_p7), %s1159_s27, 6  ;;  %s1169_s6 = scalar_lea.hbm (!%p841_p7), %s1760_s1, %s1162_s28 }
  0x12   : > { %s167_s7 = scalar_lea.vmem (!%p841_p7), [#allocation7], %s842_s29  ;;  %s164_s9 = scalar_lea.sflag (!%p841_p7), [#allocation8], %s1159_s27 }
  0x13   : > { %s174_s8 = sshll.u32 (!%p841_p7), %s167_s7, 4  ;;  %s948_s10 = scalar_lea.hbm (!%p841_p7), %s1169_s6, 1024  ;;  %s1173_s8 = int_to_ptr.vmem [resolvable:$true] %s174_s8 }
  0x14   : > { %p949_p8 = scmp.ne.s32.totalorder (!%p841_p7), %s1169_s6, %s948_s10  ;;  %s952_s13 = scalar_lea.hbm (!%p841_p7), %s1760_s1, 4096 }
  0x15   : > { %p953_p11 = scmp.lt.u32.totalorder (!%p841_p7), %s1169_s6, %s1760_s1  ;;  %p954_p12 = scmp.lt.u32.totalorder (!%p841_p7), %s952_s13, %s948_s10 }
  0x16   : > { %p950_p9 = pnand (!%p841_p7), %p949_p8, %p1148_p4  ;;  %p956_p0 = scmp.lt.u32.totalorder (!%p841_p7), %s948_s10, %s1169_s6 }
  0x17   : > { %p955_p13 = por %p954_p12, %p953_p11 }
  0x18   : > { %p951_p10 = pneg %p950_p9 }
  0x19   : > { %p957_p1 = por %p956_p0, %p955_p13 }
  0x1b   : > { %p958_p2 = pnand %p957_p1, %p951_p10 }
  0x1d   : > { %961 = shalt.err (!%p958_p2)
}
  0x1e   : > { %s962_s16 = scalar_lea.vmem %s1173_s8, 1024  ;;  %s1074_s17 = smov [#allocation7]  }
  0x1f   : > { %p963_p3 = scmp.ne.s32.totalorder %s1173_s8, %s962_s16  ;;  %s966_s22 = sshll.u32 %s1074_s17, 4  ;;  %s967_s22 = int_to_ptr.vmem [resolvable:$false] %s966_s22 }
  0x20   : > { %s968_s23 = scalar_lea.vmem %s967_s22, 2048  ;;  %p969_p8 = scmp.lt.s32.totalorder %s1173_s8, %s967_s22 }
  0x21   : > { %p964_p5 = pnand %p963_p3, %p1148_p4  ;;  %p970_p9 = scmp.lt.s32.totalorder %s968_s23, %s962_s16 }
  0x23   : > { %p965_p7 = pneg %p964_p5  ;;  %p971_p11 = por %p970_p9, %p969_p8 }
  0x25   : > { %p972_p12 = pnand %p971_p11, %p965_p7 }
  0x27   : > { %975 = shalt.err (!%p972_p12)
}
  0x28   : > { %s1075_s30 = smov 128   ;;  %s1076_s5 = smov 8  }
  0x29   : > { %885 = dma.hbm_to_vmem [thread:$0]  (%p1148_p4), %s1169_s6, 1024, %s1173_s8, %s164_s9, %s1075_s30, %s1075_s30, %s1076_s5  }
  0x2a   : > { %s184_s7 = sand.u32 1, %s1072_s20   ;;  %s845_s10 = sshll.u32 %s1159_s27, 7 }
  0x2b   : > { %s886_s11 = scalar_select %p1148_p4, [#allocation0], [#allocation16] }
  0x2c   : > { %s188_s12 = scalar_lea.vmem [#allocation10], %s845_s10  ;;  %s1077_s15 = smov 4096  }
  0x2d   : > { %s207_s13 = sshll.u32 %s188_s12, 4  ;;  %s199_s14 = sld [smem:[%s886_s11]]   ;;  %s208_s13 = int_to_ptr.vmem [resolvable:$true] %s207_s13 }
  0x2e   : > { %887 = sst [smem:[#allocation15]] (%p1148_p4), %s1077_s15  ;;  %s1078_s6 = smov 1024  }
  0x2f   : > { %888 = sst [smem:[#allocation15 + $0x1]] (%p1148_p4), %s1078_s6  ;;  %s194_s16 = scalar_lea.hbm %s1761_s2, %s1162_s28 }
  0x30   : > { %s1079_s17 = smov 8   ;;  %s1080_s22 = smov 128  }
  0x31   : > { %889 = sst [smem:[#allocation15 + $0x2]] (%p1148_p4), %s1079_s17  ;;  %s1222_s11 = scalar_lea.sflag [#allocation11], %s184_s7 }
  0x32   : > { %890 = sst [smem:[#allocation15 + $0x3]] (%p1148_p4), %s1080_s22  ;;  %s1081_s12 = smov [#allocation14]  }
  0x33   : > { %891 = sst [smem:[#allocation15 + $0x4]] (%p1148_p4), %s1080_s22  ;;  %s848_s23 = sshll.u32 %s199_s14, 26 }
  0x34   : > { %892 = sst [smem:[#allocation15 + $0x5]] (%p1148_p4), %s1079_s17  ;;  %s849_s10 = sadd.s32 134217728, %s848_s23 }
  0x35   : > { %893 = dma.general (%p1148_p4), %s194_s16, 2048, %s208_s13, %s1222_s11, %s1081_s12, [#allocation15], %s849_s10, 0  }
  0x36   : > { %s1231_s8 = scalar_lea.hbm %s1762_s3, %s1162_s28  ;;  %s234_s14 = scalar_lea.vmem [#allocation12], %s842_s29 }
  0x37   : > { %s241_s7 = sshll.u32 %s234_s14, 4  ;;  %s976_s9 = scalar_lea.hbm %s1231_s8, 1024  ;;  %s1235_s7 = int_to_ptr.vmem [resolvable:$true] %s241_s7 }
  0x38   : > { %p977_p10 = scmp.ne.s32.totalorder %s1231_s8, %s976_s9  ;;  %s980_s17 = scalar_lea.hbm %s1762_s3, 4096 }
  0x39   : > { %p981_p1 = scmp.lt.u32.totalorder %s1231_s8, %s1762_s3  ;;  %p982_p2 = scmp.lt.u32.totalorder %s980_s17, %s976_s9 }
  0x3a   : > { %p978_p13 = pnand %p977_p10, %p1148_p4  ;;  %p984_p5 = scmp.lt.u32.totalorder %s976_s9, %s1231_s8 }
  0x3b   : > { %p983_p3 = por %p982_p2, %p981_p1 }
  0x3c   : > { %p979_p0 = pneg %p978_p13 }
  0x3d   : > { %p985_p7 = por %p984_p5, %p983_p3 }
  0x3f   : > { %p986_p8 = pnand %p985_p7, %p979_p0 }
  0x41   : > { %989 = shalt.err (!%p986_p8)
}
  0x42   : > { %s990_s27 = scalar_lea.vmem %s1235_s7, 1024  ;;  %s1082_s29 = smov [#allocation12]  }
  0x43   : > { %p991_p9 = scmp.ne.s32.totalorder %s1235_s7, %s990_s27  ;;  %s994_s23 = sshll.u32 %s1082_s29, 4  ;;  %s995_s23 = int_to_ptr.vmem [resolvable:$false] %s994_s23 }
  0x44   : > { %s996_s10 = scalar_lea.vmem %s995_s23, 2048  ;;  %p997_p10 = scmp.lt.s32.totalorder %s1235_s7, %s995_s23 }
  0x45   : > { %p992_p11 = pnand %p991_p9, %p1148_p4  ;;  %p998_p13 = scmp.lt.s32.totalorder %s996_s10, %s990_s27 }
  0x47   : > { %p993_p12 = pneg %p992_p11  ;;  %p999_p1 = por %p998_p13, %p997_p10 }
  0x49   : > { %p1000_p2 = pnand %p999_p1, %p993_p12 }
  0x4b   : > { %1003 = shalt.err (!%p1000_p2)
}
  0x4c   : > { %894 = dma.hbm_to_vmem [thread:$0]  (%p1148_p4), %s1231_s8, 1024, %s1235_s7, %s1222_s11, %s1075_s30, %s1075_s30, %s1076_s5  }
  0x4d PF: > { %p853_p0 = scmp.ge.s32.totalorder %s1072_s20, 1  ;;  %p249_p3 = scmp.lt.s32.totalorder %s1072_s20, 5 }
  0x4f   : > { %p250_p5 = pnand %p853_p0, %p249_p3 }
  0x50   : > { %s255_s12 = sand.u32 (!%p250_p5), 1, %s1064_s18  }
  0x51   : > { %253 = sbr.rel (%p250_p5) target bundleno = 585 (0x249), region = 36  ;;  %s854_s15 = sshll.u32 (!%p250_p5), %s255_s12, 6 }
  0x52   : > { %s256_s6 = scalar_lea.sflag (!%p250_p5), [#allocation8], %s255_s12  ;;  %s1265_s25 = scalar_lea.vmem (!%p250_p5), [#allocation7], %s854_s15 }
  0x58   : > { %1047 = dma.done.wait (%p1153_p6), %s256_s6, 1024  }
  0x59   : > { %1049 = vsyncadd (%p1153_p6), %s256_s6, 4294966272  ;;  %s264_s30 = sand.u32 1, %s1133_s0   ;;  %s855_s5 = sshll.u32 %s255_s12, 7 }
  0x5a   : > { %s265_s11 = scalar_lea.sflag [#allocation11], %s264_s30  ;;  %s1272_s20 = scalar_lea.vmem [#allocation10], %s855_s5 }
  0x5b   : > { %1051 = dma.done.wait (%p1153_p6), %s265_s11, 3072  }
  0x5c   : > { %1053 = vsyncadd (%p1153_p6), %s265_s11, 4294964224  ;;  %s1278_s8 = scalar_lea.vmem [#allocation12], %s854_s15  ;;  %p857_p4 = scmp.ne.s32.totalorder %s1133_s0, 0 }
  0x5d   : > { %v1083_v0 = vmov (!%p857_p4), 0.0  }
  0x5e   : > { %313 = sbr.rel (%p857_p4) target bundleno = 101 (0x65), region = 52  ;;  %314 = vst [vmem:[#allocation2] sm:$0x1] (!%p857_p4), %v1083_v0  ;;  %315 = vst [vmem:[#allocation3] sm:$0x1] (!%p857_p4), %v1083_v0 }
  0x5f   : > { %316 = vst [vmem:[#allocation4] sm:$0x1] (!%p857_p4), %v1083_v0  ;;  %317 = vst [vmem:[#allocation5] sm:$0x3] (!%p857_p4), %v1083_v0 }
  0x65 PF: > { %v1282_v1 = vld [vmem:[%s1272_s20] sm:$0xff]  ;;  %v361_v2 = vlaneseq  ;;  %s1084_s26 = smov 1   ;;  %v1295_v5 = vld [vmem:[%s1272_s20 + $0x8] sm:$0xff]  ;;  %v1305_v7 = vld [vmem:[%s1272_s20 + $0x10] sm:$0xff]  ;;  %s868_s14 = sshll.u32 %s1133_s0, 6 }
  0x66   : > { %v1285_v3 = vld [vmem:[%s1265_s25] sm:$0xff]  ;;  %441 = vrot.lane.b32.xlu0 %v1282_v1, %s1084_s26  ;;  %v1298_v6 = vld [vmem:[%s1265_s25 + $0x8] sm:$0xff]  ;;  %v867_v8 = vld [vmem:[#allocation5 + $0x1] ss:$0 sm:$0xff]  ;;  %p869_p6 = scmp.ne.s32.totalorder %s1133_s0, 3 }
  0x67   : > { %408 = vrot.lane.b32.xlu1 %v1285_v3, %s1084_s26  ;;  %v1292_v4 = vshrl.u32 %v361_v2, 7  ;;  %v1309_v9 = vld [vmem:[%s1265_s25 + $0x10] sm:$0xff]  ;;  %v1312_v10 = vld [vmem:[%s1272_s20 + $0x40] sm:$0xff]  ;;  %v1315_v11 = vld [vmem:[%s1272_s20 + $0x78] sm:$0xff]  ;;  %s687_s13 = sld [smem:[#allocation6]] (!%p869_p6) }
  0x68   : > { %v1318_v12 = vld [vmem:[%s1265_s25 + $0x38] sm:$0xff]  ;;  %v457_v13 = vrot.slane %v1312_v10, 7  ;;  %v1765_v14 = vrot.slane %v1315_v11, 7  ;;  %682 = vst [vmem:[#allocation5 - $0x6] sm:$0x80] %v1315_v11  ;;  %v1325_v15 = vld [vmem:[%s1278_s8] sm:$0xff] }
  0x69   : > { %vm432_vm0 = vcmp.lt.s32.totalorder %v1292_v4, 1  ;;  %vm384_vm1 = vcmp.ge.s32.totalorder %v1292_v4, 1  ;;  %v1327_v16 = vld [vmem:[#allocation5] ss:$0 sm:$0xff]  ;;  %v1330_v17 = vld [vmem:[%s1278_s8 + $0x8] sm:$0xff]  ;;  %v513_v19 = vsub.f32 %v1285_v3, %v1325_v15  ;;  %v1362_v26 = vld [vmem:[%s1272_s20 + $0x20] sm:$0xff] }
  0x6a   : > { %443 = vrot.lane.b32.xlu0 %v1295_v5, %s1084_s26  ;;  %v472_v18 = vsel %vm432_vm0, %v1765_v14, %v457_v13  ;;  %681 = vst [vmem:[#allocation5 - $0x7] sm:$0x80] %v1318_v12  ;;  %v514_v20 = vsub.f32 %v1298_v6, %v1330_v17  ;;  %v1348_v21 = vld [vmem:[%s1272_s20 + $0x18] sm:$0xff]  ;;  %v1365_v27 = vld [vmem:[%s1265_s25 + $0x20] sm:$0xff]  ;;  %v1368_v28 = vld [vmem:[%s1278_s8 + $0x10] sm:$0xff] }
  0x6b   : > { %410 = vrot.lane.b32.xlu1 %v1298_v6, %s1084_s26  ;;  %v1351_v22 = vld [vmem:[%s1265_s25 + $0x18] sm:$0xff]  ;;  %v1355_v23 = vsel %vm384_vm1, %v472_v18, %v867_v8  ;;  %v634_v24 = vmul.f32 %v513_v19, %v513_v19  ;;  %v515_v29 = vsub.f32 %v1309_v9, %v1368_v28  ;;  %v1377_v32 = vld [vmem:[%s1272_s20 + $0x28] sm:$0xff]  ;;  %v1392_v37 = vld [vmem:[%s1272_s20 + $0x30] sm:$0xff]  ;;  %v424_v19 = vrot.slane %v1285_v3, 7 }
  0x6c   : > { %v635_v25 = vmul.f32 %v514_v20, %v514_v20  ;;  %v1380_v33 = vld [vmem:[%s1265_s25 + $0x28] sm:$0xff]  ;;  %v1383_v34 = vld [vmem:[%s1278_s8 + $0x18] sm:$0xff]  ;;  %v1395_v38 = vld [vmem:[%s1265_s25 + $0x30] sm:$0xff]  ;;  %v1429_v18 = vstv %s868_s14  ;;  %v1764_v20 = vrot.slane %v1318_v12, 7 }
  0x6d   : > { %v636_v31 = vmul.f32 %v515_v29, %v515_v29  ;;  %v516_v35 = vsub.f32 %v1351_v22, %v1383_v34  ;;  %v1398_v40 = vld [vmem:[%s1278_s8 + $0x20] sm:$0xff]  ;;  %v1407_v44 = vld [vmem:[%s1272_s20 + $0x38] sm:$0xff]  ;;  %v1410_v45 = vld [vmem:[%s1278_s8 + $0x28] sm:$0xff]  ;;  %v425_v29 = vrot.slane %v1298_v6, 7  ;;  %s722_s16 = smul.f32 (!%p869_p6), 0.5, %s687_s13 }
  0x6e   : > { %445 = vrot.lane.b32.xlu0 %v1305_v7, %s1084_s26  ;;  %v642_v30 = vadd.f32 %v635_v25, %v634_v24  ;;  %v517_v41 = vsub.f32 %v1365_v27, %v1398_v40  ;;  %v518_v46 = vsub.f32 %v1380_v33, %v1410_v45  ;;  %v1419_v49 = vld [vmem:[%s1278_s8 + $0x30] sm:$0xff]  ;;  %v1424_v52 = vld [vmem:[%s1278_s8 + $0x38] sm:$0xff]  ;;  %v1434_v24 = vand.u32 127, %v361_v2 }
  0x6f   : > { %412 = vrot.lane.b32.xlu1 %v1309_v9, %s1084_s26  ;;  %v637_v39 = vmul.f32 %v516_v35, %v516_v35  ;;  %v519_v51 = vsub.f32 %v1395_v38, %v1419_v49  ;;  %v520_v54 = vsub.f32 %v1318_v12, %v1424_v52  ;;  %v633_v63 = vld [vmem:[#allocation3] sm:$0x1]  ;;  %v363_v25 = vadd.s32 8, %v1292_v4 }
  0x70   : > { %v643_v36 = vadd.f32 %v642_v30, %v636_v31  ;;  %v638_v43 = vmul.f32 %v517_v41, %v517_v41  ;;  %v639_v48 = vmul.f32 %v518_v46, %v518_v46  ;;  %v374_v30 = vadd.s32 %v1429_v18, %v1292_v4  ;;  %v859_v31 = vld [vmem:[%s1272_s20 + $0x48] sm:$0xff] }
  0x71   : > { %v640_v53 = vmul.f32 %v519_v51, %v519_v51  ;;  %v641_v56 = vmul.f32 %v520_v54, %v520_v54  ;;  %v440_v35 = vsel %vm432_vm0, %v1764_v20, %v424_v19  ;;  %vm383_vm2 = vcmp.lt.s32.totalorder %v1434_v24, 127 }
  0x72   : > { %447 = vrot.lane.b32.xlu0 %v1348_v21, %s1084_s26  ;;  %v644_v42 = vadd.f32 %v643_v36, %v637_v39  ;;  %v364_v36 = vadd.s32 16, %v1292_v4  ;;  %v375_v2 = vadd.s32 %v1429_v18, %v363_v25  ;;  %v860_v39 = vld [vmem:[%s1272_s20 + $0x50] sm:$0xff]  ;;  %vm392_vm3 = vcmp.ge.s32.totalorder %v374_v30, 1 }
  0x73   : > { %414 = vrot.lane.b32.xlu1 %v1351_v22, %s1084_s26  ;;  %vm400_vm4 = vcmp.lt.s32.totalorder %v374_v30, 255  ;;  %v458_v41 = vrot.slane %v859_v31, 7  ;;  %v427_v46 = vrot.slane %v1351_v22, 7  ;;  %vm382_vm7 = vcmp.ge.s32.totalorder %v1434_v24, 1 }
  0x74   : > { %v645_v47 = vadd.f32 %v644_v42, %v638_v43  ;;  %v439_v42 = vsel %vm432_vm0, %v424_v19, %v425_v29  ;;  %v426_v43 = vrot.slane %v1309_v9, 7  ;;  %v376_v51 = vadd.s32 %v1429_v18, %v364_v36  ;;  %v862_v19 = vld [vmem:[%s1272_s20 + $0x60] sm:$0xff] }
  0x75   : > { %v1464_v54 = vsel %vm400_vm4, %v1312_v10, 0.0  ;;  %vm393_vm5 = vcmp.ge.s32.totalorder %v375_v2, 1  ;;  %vm401_vm6 = vcmp.lt.s32.totalorder %v375_v2, 255  ;;  %v1487_v10 = vsel %vm383_vm2, %v1295_v5, 0.0 }
  0x76   : > { %449 = vrot.lane.b32.xlu0 %v1362_v26, %s1084_s26  ;;  %v646_v50 = vadd.f32 %v645_v47, %v639_v48  ;;  %v489_v47 = vsel %vm384_vm1, %v440_v35, %v1327_v16  ;;  %v1459_v48 = vsel %vm383_vm2, %v1282_v1, 0.0  ;;  %v498_v16 = vsub.f32 %v1298_v6, %v439_v42 }
  0x77   : > { %416 = vrot.lane.b32.xlu1 %v1365_v27, %s1084_s26  ;;  %v471_v1 = vsel %vm432_vm0, %v457_v13, %v458_v41  ;;  %vm394_vm8 = vcmp.ge.s32.totalorder %v376_v51, 1  ;;  %vm402_vm9 = vcmp.lt.s32.totalorder %v376_v51, 255  ;;  %v461_v42 = vrot.slane %v862_v19, 7 }
  0x78   : > { %v647_v55 = vadd.f32 %v646_v50, %v640_v53  ;;  %v428_v50 = vrot.slane %v1365_v27, 7  ;;  %v459_v53 = vrot.slane %v860_v39, 7  ;;  %v1503_v5 = vsel %vm393_vm5, %v498_v16, 0.0 }
  0x79   : > { %v1507_v36 = vsel %vm402_vm9, %v860_v39, 0.0  ;;  %v1525_v16 = vsel %vm383_vm2, %v1305_v7, 0.0  ;;  %v368_v7 = vadd.s32 48, %v1292_v4 }
  0x7a   : > { %451 = vrot.lane.b32.xlu0 %v1377_v32, %s1084_s26  ;;  %v648_v57 = vadd.f32 %v647_v55, %v641_v56  ;;  %v1468_v55 = vsel %vm392_vm3, %v1355_v23, 0.0  ;;  %v497_v56 = vsub.f32 %v1285_v3, %v489_v47  ;;  %v429_v23 = vrot.slane %v1380_v33, 7 }
  0x7b   : > { %418 = vrot.lane.b32.xlu1 %v1380_v33, %s1084_s26  ;;  %v470_v13 = vsel %vm432_vm0, %v458_v41, %v459_v53  ;;  %v437_v41 = vsel %vm432_vm0, %v426_v43, %v427_v46  ;;  %v436_v47 = vsel %vm432_vm0, %v427_v46, %v428_v50  ;;  %v380_v20 = vadd.s32 %v1429_v18, %v368_v7 }
  0x7c   : > { %v649_v58 = vrot.slane %v648_v57, 4  ;;  %v1500_v25 = vsel %vm392_vm3, %v497_v56, 0.0  ;;  %v500_v46 = vsub.f32 %v1351_v22, %v437_v41 }
  0x7d   : > { %vm406_vm1 = vcmp.lt.s32.totalorder %v380_v20, 255  ;;  %vm398_vm3 = vcmp.ge.s32.totalorder %v380_v20, 1 }
  0x7e   : > { %453 = vrot.lane.b32.xlu0 %v1392_v37, %s1084_s26  ;;  %v650_v59 = vadd.f32 %v649_v58, %v648_v57  ;;  %v861_v57 = vld [vmem:[%s1272_s20 + $0x58] sm:$0xff]  ;;  %v365_v58 = vadd.s32 24, %v1292_v4 }
  0x7f   : > { %420 = vrot.lane.b32.xlu1 %v1395_v38, %s1084_s26 }
  0x80   : > { %v651_v60 = vrot.slane %v650_v59, 2  ;;  %v377_v35 = vadd.s32 %v1429_v18, %v365_v58 }
  0x82   : > { %455 = vrot.lane.b32.xlu0 %v1407_v44, %s1084_s26  ;;  %v652_v61 = vadd.f32 %v651_v60, %v650_v59  ;;  %v430_v59 = vrot.slane %v1395_v38, 7  ;;  %v438_v60 = vsel %vm432_vm0, %v425_v29, %v426_v43  ;;  %vm395_vm10 = vcmp.ge.s32.totalorder %v377_v35, 1 }
  0x83   : > { %422 = vrot.lane.b32.xlu1 %v1318_v12, %s1084_s26  ;;  %v499_v29 = vsub.f32 %v1309_v9, %v438_v60  ;;  %vm403_vm11 = vcmp.lt.s32.totalorder %v377_v35, 255  ;;  %v501_v60 = vsub.f32 %v1365_v27, %v436_v47  ;;  %v1556_v47 = vld [vmem:[%s1272_s20 + $0x70] sm:$0xff]  ;;  %v1562_v39 = vsel %vm395_vm10, %v500_v46, 0.0 }
  0x84   : > { %v653_v62 = vrot.slane %v652_v61, 1  ;;  %v463_v46 = vrot.slane %v1556_v47, 7  ;;  %v605_v7 = vand.u32 2147483647, %v1562_v39 }
  0x85   : > { %v1534_v58 = vsel %vm394_vm8, %v499_v29, 0.0 }
  0x86   : > { %v654_v0 = vadd.f32 %v653_v62, %v652_v61  ;;  %v366_v61 = vadd.s32 32, %v1292_v4  ;;  %v569_v62 = vsub.f32 %v1464_v54, %v1468_v55  ;;  %v367_v54 = vadd.s32 40, %v1292_v4 }
  0x88   : > { %v655_v8 = vadd.f32 %v654_v0, %v633_v63  ;;  %v1493_v63 = vsel %vm401_vm6, %v859_v31, 0.0  ;;  %v1496_v0 = vsel %vm393_vm5, %v471_v1, 0.0  ;;  %v1510_v31 = vsel %vm394_vm8, %v470_v13, 0.0  ;;  %v863_v1 = vld [vmem:[%s1272_s20 + $0x68] sm:$0xff] }
  0x89   : > { %v378_v30 = vadd.s32 %v1429_v18, %v366_v61  ;;  %v570_v2 = vsub.f32 %v1493_v63, %v1496_v0  ;;  %v571_v56 = vsub.f32 %v1507_v36, %v1510_v31  ;;  %v379_v13 = vadd.s32 %v1429_v18, %v367_v54 }
  0x8a   : > { %656 = vst [vmem:[#allocation3] sm:$0x1] %v655_v8  ;;  %v460_v8 = vrot.slane %v861_v57, 7  ;;  %v1546_v0 = vsel %vm403_vm11, %v861_v57, 0.0  ;;  %v462_v41 = vrot.slane %v863_v1, 7 }
  0x8b   : > { %vm404_vm12 = vcmp.lt.s32.totalorder %v378_v30, 255  ;;  %vm396_vm13 = vcmp.ge.s32.totalorder %v378_v30, 1  ;;  %vm405_vm14 = vcmp.lt.s32.totalorder %v379_v13, 255  ;;  %vm397_vm15 = vcmp.ge.s32.totalorder %v379_v13, 1 }
  0x8c   : > { %v469_v43 = vsel %vm432_vm0, %v459_v53, %v460_v8  ;;  %v1541_v53 = vsel %vm383_vm2, %v1348_v21, 0.0  ;;  %v468_v61 = vsel %vm432_vm0, %v460_v8, %v461_v42  ;;  %v435_v21 = vsel %vm432_vm0, %v428_v50, %v429_v23 }
  0x8d   : > { %v1549_v29 = vsel %vm395_vm10, %v469_v43, 0.0  ;;  %v1565_v57 = vsel %vm404_vm12, %v862_v19, 0.0  ;;  %v1569_v55 = vsel %vm396_vm13, %v468_v61, 0.0  ;;  %v1572_v50 = vsel %vm396_vm13, %v501_v60, 0.0 }
  0x8e   : > { %v502_v35 = vsub.f32 %v1380_v33, %v435_v21  ;;  %v467_v30 = vsel %vm432_vm0, %v461_v42, %v462_v41  ;;  %v573_v61 = vsub.f32 %v1565_v57, %v1569_v55  ;;  %v1598_v13 = vsel %vm405_vm14, %v863_v1, 0.0 }
  0x8f   : > { %v1600_v42 = vsel %vm397_vm15, %v467_v30, 0.0  ;;  %v466_v21 = vsel %vm432_vm0, %v462_v41, %v463_v46 }
  0xd8   : > { %v442_v63 = vpop.permute.xlu0 %441 }
  0xd9   : > { %v409_v51 = vpop.permute.xlu1 %408  ;;  %v529_v8 = vsel %vm382_vm7, %v442_v63, 0.0  ;;  %v572_v63 = vsub.f32 %v1546_v0, %v1549_v29  ;;  %v1602_v29 = vsel %vm397_vm15, %v502_v35, 0.0 }
  0xda   : > { %v537_v43 = vsub.f32 %v1459_v48, %v529_v8  ;;  %v1582_v48 = vsel %vm383_vm2, %v1362_v26, 0.0  ;;  %v1596_v26 = vsel %vm383_vm2, %v1377_v32, 0.0  ;;  %v434_v32 = vsel %vm432_vm0, %v429_v23, %v430_v59 }
  0xdb   : > { %v473_v1 = vsub.f32 %v1285_v3, %v409_v51  ;;  %v1629_v23 = vsel %vm398_vm3, %v466_v21, 0.0  ;;  %v574_v3 = vsub.f32 %v1598_v13, %v1600_v42  ;;  %v607_v51 = vand.u32 2147483647, %v1602_v29 }
  0xdc   : > { %v577_v19 = vadd.f32 %v569_v62, %v537_v43  ;;  %v444_v54 = vpop.permute.xlu0 %443  ;;  %v606_v62 = vand.u32 2147483647, %v1572_v50  ;;  %v528_v50 = vsel %vm383_vm2, %v1407_v44, 0.0 }
  0xdd   : > { %v411_v14 = vpop.permute.xlu1 %410  ;;  %v530_v60 = vsel %vm382_vm7, %v444_v54, 0.0  ;;  %v481_v13 = vsel %vm382_vm7, %v473_v1, 0.0 }
  0xde   : > { %v538_v0 = vsub.f32 %v1487_v10, %v530_v60  ;;  %v585_v8 = vsub.f32 %v1325_v15, %v577_v19  ;;  %v474_v10 = vsub.f32 %v1298_v6, %v411_v14  ;;  %v1620_v15 = vsel %vm383_vm2, %v1392_v37, 0.0 }
  0xdf   : > { %v1623_v6 = vsel %vm406_vm1, %v1556_v47, 0.0  ;;  %v503_v37 = vsub.f32 %v1395_v38, %v434_v32  ;;  %v369_v19 = vadd.s32 56, %v1292_v4  ;;  %v1768_v32 = vrot.slane %v1315_v11, 7 }
  0xe0   : > { %v578_v54 = vadd.f32 %v570_v2, %v538_v0  ;;  %v446_v43 = vpop.permute.xlu0 %445  ;;  %v658_v47 = vmul.f32 %v585_v8, %v585_v8  ;;  %v575_v8 = vsub.f32 %v1623_v6, %v1629_v23  ;;  %v594_v1 = vand.u32 2147483647, %v481_v13 }
  0xe1   : > { %v413_v60 = vpop.permute.xlu1 %412  ;;  %v531_v35 = vsel %vm382_vm7, %v446_v43, 0.0  ;;  %v1653_v43 = vsel %vm398_vm3, %v503_v37, 0.0  ;;  %vm689_vm2 = vcmask (!%p869_p6), 1040384  }
  0xe2   : > { %v586_v14 = vsub.f32 %v1330_v17, %v578_v54  ;;  %v539_v2 = vsub.f32 %v1525_v16, %v531_v35  ;;  %v475_v41 = vsub.f32 %v1309_v9, %v413_v60  ;;  %v482_v17 = vsel %vm382_vm7, %v474_v10, 0.0 }
  0xe3   : > { %v381_v60 = vadd.s32 %v1429_v18, %v369_v19  ;;  %v1769_v18 = vrot.slane %v1318_v12, 7 }
  0xe4   : > { %v659_v30 = vmul.f32 %v586_v14, %v586_v14  ;;  %v579_v9 = vadd.f32 %v571_v56, %v539_v2  ;;  %v448_v16 = vpop.permute.xlu0 %447  ;;  %v483_v36 = vsel %vm382_vm7, %v475_v41, 0.0  ;;  %v595_v56 = vand.u32 2147483647, %v482_v17 }
  0xe5   : > { %v415_v0 = vpop.permute.xlu1 %414  ;;  %v532_v42 = vsel %vm382_vm7, %v448_v16, 0.0  ;;  %v1770_v17 = vand.u32 2147483647, %v1503_v5  ;;  %vm399_vm4 = vcmp.ge.s32.totalorder %v381_v60, 1 }
  0xe6   : > { %v476_v21 = vsub.f32 %v1351_v22, %v415_v0  ;;  %v666_v54 = vadd.f32 %v659_v30, %v658_v47  ;;  %v587_v10 = vsub.f32 %v1368_v28, %v579_v9  ;;  %v540_v31 = vsub.f32 %v1541_v53, %v532_v42 }
  0xe7   : > { %v465_v22 = vsel %vm432_vm0, %v463_v46, %v1768_v32  ;;  %v596_v53 = vand.u32 2147483647, %v483_v36  ;;  %v433_v46 = vsel %vm432_vm0, %v430_v59, %v1769_v18  ;;  %v608_v30 = vand.u32 2147483647, %v1653_v43 }
  0xe8   : > { %v660_v35 = vmul.f32 %v587_v10, %v587_v10  ;;  %v580_v14 = vadd.f32 %v572_v63, %v540_v31  ;;  %v484_v28 = vsel %vm382_vm7, %v476_v21, 0.0  ;;  %v450_v2 = vpop.permute.xlu0 %449  ;;  %v611_v9 = vadd.f32 %v1770_v17, %v595_v56 }
  0xe9   : > { %v417_v41 = vpop.permute.xlu1 %416  ;;  %v533_v20 = vsel %vm382_vm7, %v450_v2, 0.0  ;;  %v597_v16 = vand.u32 2147483647, %v484_v28  ;;  %v1771_v0 = vand.u32 2147483647, %v1500_v25  ;;  %vm407_vm0 = vcmp.lt.s32.totalorder %v381_v60, 255 }
  0xea   : > { %v477_v37 = vsub.f32 %v1365_v27, %v417_v41  ;;  %v667_v19 = vadd.f32 %v666_v54, %v660_v35  ;;  %v588_v63 = vsub.f32 %v1383_v34, %v580_v14  ;;  %v541_v47 = vsub.f32 %v1582_v48, %v533_v20 }
  0xeb   : > { %v610_v13 = vadd.f32 %v1771_v0, %v594_v1  ;;  %v1772_v42 = vand.u32 2147483647, %v1534_v58  ;;  %v504_v55 = vsub.f32 %v1318_v12, %v433_v46  ;;  %v560_v56 = vsel %vm407_vm0, %v1315_v11, 0.0 }
  0xec   : > { %v485_v27 = vsel %vm382_vm7, %v477_v37, 0.0  ;;  %v661_v4 = vmul.f32 %v588_v63, %v588_v63  ;;  %v581_v34 = vadd.f32 %v573_v61, %v541_v47  ;;  %v452_v59 = vpop.permute.xlu0 %451  ;;  %v613_v61 = vadd.f32 %v605_v7, %v597_v16 }
  0xed   : > { %v419_v48 = vpop.permute.xlu1 %418  ;;  %v612_v5 = vadd.f32 %v1772_v42, %v596_v53  ;;  %v598_v21 = vand.u32 2147483647, %v485_v27  ;;  %v534_v54 = vsel %vm382_vm7, %v452_v59, 0.0  ;;  %v618_v57 = vadd.f32 %v611_v9, %v610_v13 }
  0xee   : > { %v478_v10 = vsub.f32 %v1380_v33, %v419_v48  ;;  %v668_v36 = vadd.f32 %v667_v19, %v661_v4  ;;  %v589_v25 = vsub.f32 %v1398_v40, %v581_v34  ;;  %v542_v31 = vsub.f32 %v1596_v26, %v534_v54  ;;  %v593_v54 = vld [vmem:[#allocation2] sm:$0x1] }
  0xef   : > { %v568_v40 = vsel %vm399_vm4, %v465_v22, 0.0  ;;  %v619_v14 = vadd.f32 %v618_v57, %v612_v5  ;;  %v614_v26 = vadd.f32 %v606_v62, %v598_v21 }
  0xf0   : > { %v486_v58 = vsel %vm382_vm7, %v478_v10, 0.0  ;;  %v662_v43 = vmul.f32 %v589_v25, %v589_v25  ;;  %v582_v32 = vadd.f32 %v574_v3, %v542_v31  ;;  %v454_v33 = vpop.permute.xlu0 %453  ;;  %v512_v3 = vsel %vm399_vm4, %v504_v55, 0.0  ;;  %v657_v25 = vld [vmem:[#allocation4] sm:$0x1] }
  0xf1   : > { %v599_v1 = vand.u32 2147483647, %v486_v58  ;;  %v421_v35 = vpop.permute.xlu1 %420  ;;  %v535_v39 = vsel %vm382_vm7, %v454_v33, 0.0  ;;  %v620_v41 = vadd.f32 %v619_v14, %v613_v61  ;;  %v576_v62 = vsub.f32 %v560_v56, %v568_v40  ;;  %v700_v61 = vld [vmem:[#allocation3] sm:$0x1] (!%p869_p6) }
  0xf2   : > { %v479_v7 = vsub.f32 %v1395_v38, %v421_v35  ;;  %v669_v28 = vadd.f32 %v668_v36, %v662_v43  ;;  %v590_v2 = vsub.f32 %v1410_v45, %v582_v32  ;;  %v543_v11 = vsub.f32 %v1620_v15, %v535_v39 }
  0xf3   : > { %v615_v38 = vadd.f32 %v607_v51, %v599_v1  ;;  %v621_v37 = vadd.f32 %v620_v41, %v614_v26  ;;  %v609_v46 = vand.u32 2147483647, %v512_v3  ;;  %v701_v32 = vsel (!%p869_p6), %vm689_vm2, %v700_v61, 0.0 }
  0xf4   : > { %v487_v22 = vsel %vm382_vm7, %v479_v7, 0.0  ;;  %v663_v53 = vmul.f32 %v590_v2, %v590_v2  ;;  %v583_v45 = vadd.f32 %v575_v8, %v543_v11  ;;  %v456_v60 = vpop.permute.xlu0 %455 }
  0xf5   : > { %v600_v15 = vand.u32 2147483647, %v487_v22  ;;  %v423_v20 = vpop.permute.xlu1 %422  ;;  %v536_v18 = vsel %vm382_vm7, %v456_v60, 0.0  ;;  %v622_v6 = vadd.f32 %v621_v37, %v615_v38 }
  0xf6   : > { %v480_v19 = vsub.f32 %v1318_v12, %v423_v20  ;;  %v670_v44 = vadd.f32 %v669_v28, %v663_v53  ;;  %v591_v63 = vsub.f32 %v1419_v49, %v583_v45  ;;  %v544_v29 = vsub.f32 %v528_v50, %v536_v18 }
  0xf7   : > { %v616_v47 = vadd.f32 %v608_v30, %v600_v15 }
  0xf8   : > { %v488_v51 = vsel %vm382_vm7, %v480_v19, 0.0  ;;  %v664_v23 = vmul.f32 %v591_v63, %v591_v63  ;;  %v584_v8 = vadd.f32 %v576_v62, %v544_v29  ;;  %vm737_vm7 = vcmask (!%p869_p6), 0  }
  0xf9   : > { %v601_v17 = vand.u32 2147483647, %v488_v51  ;;  %v623_v16 = vadd.f32 %v622_v6, %v616_v47 }
  0xfa   : > { %v671_v9 = vadd.f32 %v670_v44, %v664_v23  ;;  %v592_v27 = vsub.f32 %v1424_v52, %v584_v8 }
  0xfb   : > { %v617_v0 = vadd.f32 %v609_v46, %v601_v17 }
  0xfc   : > { %v665_v13 = vmul.f32 %v592_v27, %v592_v27 }
  0xfd   : > { %v624_v4 = vadd.f32 %v623_v16, %v617_v0 }
  0xfe   : > { %v672_v12 = vadd.f32 %v671_v9, %v665_v13 }
  0xff   : > { %v625_v34 = vrot.slane %v624_v4, 4 }
 0x100   : > { %v673_v59 = vrot.slane %v672_v12, 4 }
 0x101   : > { %v626_v49 = vadd.f32 %v625_v34, %v624_v4 }
 0x102   : > { %v674_v30 = vadd.f32 %v673_v59, %v672_v12 }
 0x103   : > { %v627_v48 = vrot.slane %v626_v49, 2 }
 0x104   : > { %v675_v42 = vrot.slane %v674_v30, 2 }
 0x105   : > { %v628_v24 = vadd.f32 %v627_v48, %v626_v49 }
 0x106   : > { %v676_v5 = vadd.f32 %v675_v42, %v674_v30 }
 0x107   : > { %v629_v21 = vrot.slane %v628_v24, 1 }
 0x108   : > { %v677_v10 = vrot.slane %v676_v5, 1  ;;  %686 = sbr.rel (%p869_p6) target bundleno = 560 (0x230), region = 56 }
 0x109   : > { %v630_v36 = vadd.f32 %v629_v21, %v628_v24 }
 0x10a   : > { %v678_v31 = vadd.f32 %v677_v10, %v676_v5 }
 0x10b   : > { %v631_v55 = vadd.f32 %v630_v36, %v593_v54 }
 0x10c   : > { %v679_v52 = vadd.f32 %v678_v31, %v657_v25 }
 0x10d   : > { %632 = vst [vmem:[#allocation2] sm:$0x1] %v631_v55 }
 0x10e   : > { %680 = vst [vmem:[#allocation4] sm:$0x1] %v679_v52 }
 0x114   : > { %v688_v57 = vld [vmem:[#allocation2] sm:$0x1] }
 0x115   : > { %v690_v58 = vsel %vm689_vm2, %v688_v57, 0.0  ;;  %v711_v56 = vld [vmem:[#allocation4] sm:$0x1] }
 0x116   : > { %691 = vadd.xlane.f32.xlu0 %v690_v58  ;;  %v712_v43 = vsel %vm689_vm2, %v711_v56, 0.0 }
 0x117   : > { %713 = vadd.xlane.f32.xlu1 %v712_v43 }
 0x11a   : > { %702 = vadd.xlane.f32.xlu0 %v701_v32 }
 0x1a3   : > { %v692_v1 = vpop.xlane.xlu0 %691 }
 0x1a4   : > { %v693_v33 = vrot.slane %v692_v1, 4  ;;  %v714_v35 = vpop.xlane.xlu1 %713 }
 0x1a5   : > { %v715_v40 = vrot.slane %v714_v35, 4 }
 0x1a6   : > { %v694_v14 = vadd.f32 %v693_v33, %v692_v1 }
 0x1a7   : > { %v703_v26 = vpop.xlane.xlu0 %702  ;;  %v716_v39 = vadd.f32 %v715_v40, %v714_v35 }
 0x1a8   : > { %v695_v7 = vrot.slane %v694_v14, 2  ;;  %v704_v28 = vrot.slane %v703_v26, 4 }
 0x1a9   : > { %v717_v2 = vrot.slane %v716_v39, 2 }
 0x1aa   : > { %v705_v11 = vadd.f32 %v704_v28, %v703_v26  ;;  %v696_v3 = vadd.f32 %v695_v7, %v694_v14 }
 0x1ab   : > { %v718_v41 = vadd.f32 %v717_v2, %v716_v39 }
 0x1ac   : > { %v706_v22 = vrot.slane %v705_v11, 2  ;;  %v697_v50 = vrot.slane %v696_v3, 1 }
 0x1ad   : > { %v719_v62 = vrot.slane %v718_v41, 1 }
 0x1ae   : > { %v707_v53 = vadd.f32 %v706_v22, %v705_v11  ;;  %v698_v38 = vadd.f32 %v697_v50, %v696_v3 }
 0x1af   : > { %v720_v15 = vadd.f32 %v719_v62, %v718_v41 }
 0x1b0   : > { %877 = vpush %v698_v38  ;;  %v708_v45 = vrot.slane %v707_v53, 1 }
 0x1b2   : > { %v709_v60 = vadd.f32 %v708_v45, %v707_v53 }
 0x1b4   : > { %879 = vpush %v709_v60 }
 0x1b5   : > { %881 = vpush %v720_v15 }
 0x1e1   : > { %s878_s7 = spop %877 }
 0x1e5   : > { %s880_s9 = spop %879 }
 0x1e6   : > { %v723_v20 = vstv %s880_s9  ;;  %s882_s17 = spop %881 }
 0x1e7   : > { %946 = vrsqrt.f32 %v723_v20  ;;  %vm726_vm5 = vcmp.eq.f32.partialorder %v723_v20, inf  ;;  %v729_v46 = vand.u32 2147483648, %v723_v20  ;;  %vm728_vm6 = vcmp.eq.f32.partialorder %v723_v20, 0.0  ;;  %s734_s27 = smul.f32 0.5, %s882_s17 }
 0x1f1   : > { %v947_v37 = vpop.eup %946 }
 0x1f2   : > { %v725_v18 = vmul.f32 %v947_v37, %v723_v20 }
 0x1f4   : > { %v727_v19 = vsel %vm726_vm5, %v723_v20, %v725_v18 }
 0x1f5   : > { %v730_v44 = vsel %vm728_vm6, %v729_v46, %v727_v19 }
 0x1f6   : > { %883 = vpush %v730_v44 }
 0x227   : > { %s884_s28 = spop %883 }
 0x228   : > { %s732_s22 = smul.f32 %s884_s28, %s722_s16 }
 0x22a   : > { %s733_s29 = sadd.f32 %s878_s7, %s732_s22 }
 0x22c   : > { %s735_s23 = sadd.f32 %s734_s27, %s733_s29 }
 0x22e   : > { %v736_v63 = vstv %s735_s23 }
 0x22f   : > { %738 = vst.msk [vmem:[#allocation13] sm:$0x1] %vm737_vm7, %v736_v63 }
 0x230 PF: > { %p902_p7 = scmp.eq.s32.totalorder %s1133_s0, 3  ;;  %s1085_s10 = smov [#allocation13]  }
 0x231   : > { %s746_s12 = sshll.u32 %s1085_s10, 4  ;;  %s747_s12 = int_to_ptr.vmem [resolvable:$true] %s746_s12 }
 0x232   : > { %s1004_s15 = scalar_lea.vmem %s747_s12, 16  ;;  %s1010_s6 = scalar_lea.vmem %s747_s12, 32 }
 0x233   : > { %p1005_p8 = scmp.ne.s32.totalorder %s747_s12, %s1004_s15  ;;  %p1011_p12 = scmp.lt.s32.totalorder %s747_s12, %s747_s12 }
 0x234   : > { %p1012_p10 = scmp.lt.s32.totalorder %s1010_s6, %s1004_s15 }
 0x235   : > { %p1006_p9 = pnand %p1005_p8, %p902_p7 }
 0x236   : > { %p1013_p13 = por %p1012_p10, %p1011_p12 }
 0x237   : > { %p1007_p11 = pneg %p1006_p9 }
 0x239   : > { %p1014_p1 = pnand %p1013_p13, %p1007_p11 }
 0x23b   : > { %1017 = shalt.err (!%p1014_p1)
}
 0x23c   : > { %s1018_s5 = scalar_lea.hbm %s1763_s4, 16 }
 0x23d   : > { %p1019_p2 = scmp.ne.s32.totalorder %s1763_s4, %s1018_s5  ;;  %p1024_p5 = scmp.lt.u32.totalorder %s1018_s5, %s1763_s4 }
 0x23f   : > { %p1020_p0 = pnand %p1019_p2, %p902_p7 }
 0x241   : > { %p1021_p3 = pneg %p1020_p0 }
 0x243   : > { %p1026_p4 = pnand %p1024_p5, %p1021_p3 }
 0x245   : > { %1029 = shalt.err (!%p1026_p4)
}
 0x246   : > { %899 = dma.vmem_to_hbm [thread:$0]  (%p902_p7), %s747_s12, 16, %s1763_s4, [#allocation9]  }
 0x247   : > { %1055 = dma.done.wait (%p902_p7), [#allocation9], 16  }
 0x248   : > { %1057 = vsyncadd (%p902_p7), [#allocation9], 4294967280 }
 0x249 PF: > { %p19_p6 = scmp.ge.s32.totalorder %s1136_s21, 6   ;;  %s1773_s17 = smov %s1064_s18 }
 0x24a   : > { %s1774_s18 = smov %s1068_s19  ;;  %s1775_s19 = smov %s1146_s24 }
 0x24b   : > { %s1776_s20 = smov %s1136_s21  ;;  %21 = sbr.rel (!%p19_p6) target bundleno = 8 (0x8), region = 111 }
 0x252   :  { %759 = vsyncpa [#allocation8], 1 }
 0x253   :  { %761 = vsyncpa [#allocation8 + $0x1], 1 }
 0x254   :  { %762 = vsyncpa [#allocation11], 1 }
 0x255   :  { %764 = vsyncpa [#allocation11 + $0x1], 1 }
 0x256   :  { %765 = vsyncpa [#allocation9], 1 }
 0x257   :  { %767 = vsyncpa [#allocation9 + $0x1], 1 }

</bundles_post_ra>
